<compile_context>
chip_gen: v5e
topology: v5e:2x2
jax: 0.10.0
libtpu: 0.0.40
codegen_flags: <defaults>
</compile_context>

<pallas_src>
import functools

import jax
import jax.numpy as jnp
from jax import lax
from jax.experimental import pallas as pl
from jax.experimental.pallas import tpu as pltpu


def logreg_kernel(x_ref, w_ref, b_ref, o_ref):
    # x_ref: (TB, D) VMEM   w_ref: (1, D) VMEM   b_ref: (1,) SMEM
    # o_ref: (1, TB) VMEM   (lane-dense: one sample per lane)
    z = lax.dot_general(
        w_ref[...], x_ref[...],
        dimension_numbers=(((1,), (1,)), ((), ())),  # contract feature axis of both
        preferred_element_type=jnp.float32,
    )                                  # (1, TB) f32, already lane-major
    z = z + b_ref[0]                   # scalar bias read from SMEM
    o_ref[...] = jax.nn.sigmoid(z).astype(o_ref.dtype)


def _pick_batch_tile(B, D, block_b, vmem_budget_bytes):
    """Largest multiple-of-128 batch tile s.t. the double-buffered x tile fits the budget."""
    # Double-buffered x tile: 2 * tb * D * 4 bytes (weight + output are negligible).
    max_tb_by_vmem = max(128, (vmem_budget_bytes // (2 * D * 4)) // 128 * 128)
    tb = min(block_b, max_tb_by_vmem, pl.cdiv(B, 128) * 128)
    return max(128, pl.cdiv(tb, 128) * 128)


@functools.partial(jax.jit, static_argnames=("block_b",))
def logistic_regression_forward(x, weight, bias, *, block_b=2048):
    """x: (B, D) f32; weight: (1, D) f32 (PyTorch nn.Linear layout); bias: (1,) f32."""
    B, D = x.shape
    x = x.astype(jnp.float32)
    w = weight.astype(jnp.float32).reshape(1, D)
    b = bias.astype(jnp.float32).reshape(1)

    # ~12 MiB budget for the double-buffered x tile: big tiles (fewer per-step
    # overheads, better HBM-roofline fraction) while staying well under the
    # default scoped-VMEM limit on every generation (v5e/v6e: 128 MiB physical,
    # v7x: 64 MiB physical).
    tb = _pick_batch_tile(B, D, block_b, vmem_budget_bytes=12 * 1024 * 1024)
    b_pad = pl.cdiv(B, tb) * tb
    if b_pad != B:
        x = jnp.pad(x, ((0, b_pad - B), (0, 0)))
    num_tiles = b_pad // tb

    out = pl.pallas_call(
        logreg_kernel,
        out_shape=jax.ShapeDtypeStruct((1, b_pad), jnp.float32),
        grid=(num_tiles,),
        in_specs=[
            pl.BlockSpec((tb, D), lambda i: (i, 0)),             # x: one batch tile/step
            pl.BlockSpec((1, D), lambda i: (0, 0)),              # weight: VMEM-resident
            pl.BlockSpec(memory_space=pltpu.MemorySpace.SMEM),   # bias: SMEM scalar
        ],
        out_specs=pl.BlockSpec((1, tb), lambda i: (0, i)),       # lane-dense output row
        compiler_params=pltpu.CompilerParams(
            dimension_semantics=("parallel",),   # lets v7x split the grid across both TCs
            vmem_limit_bytes=48 * 1024 * 1024,
        ),
    )(x, w, b)

    # Back to the PyTorch (B, 1) output shape; drop padded samples.
    return out[0, :B].reshape(B, 1)


if __name__ == "__main__":
    key = jax.random.PRNGKey(0)
    kx, kw, kb = jax.random.split(key, 3)

    batch = 8
    input_dim = 32

    x = jax.random.normal(kx, (batch, input_dim), dtype=jnp.float32)
    # Deterministic parameter init (mimics nn.Linear's uniform init bound).
    bound = 1.0 / jnp.sqrt(input_dim)
    weight = jax.random.uniform(kw, (1, input_dim), minval=-bound, maxval=bound,
                                dtype=jnp.float32)
    bias = jax.random.uniform(kb, (1,), minval=-bound, maxval=bound,
                              dtype=jnp.float32)

    out = logistic_regression_forward(x, weight, bias)
    out = jax.block_until_ready(out)

    ref = jax.nn.sigmoid(x @ weight.T + bias)
    assert out.shape == (batch, 1)
    assert jnp.allclose(out, ref, atol=1e-5, rtol=1e-5)

    # Second check: batch not divisible by the tile -> exercises the multi-tile
    # grid and the tail-padding path.
    batch2 = 300
    x2 = jax.random.normal(kx, (batch2, input_dim), dtype=jnp.float32)
    out2 = jax.block_until_ready(
        logistic_regression_forward(x2, weight, bias, block_b=128))
    ref2 = jax.nn.sigmoid(x2 @ weight.T + bias)
    assert out2.shape == (batch2, 1)
    assert jnp.allclose(out2, ref2, atol=1e-5, rtol=1e-5)

    print("KERNEL_OK")
</pallas_src>

<mosaic_0001>
module attributes {stable_mosaic.version = 11 : i64} {
  func.func @logreg_kernel(%arg0: i32, %arg1: memref<128x32xf32, #tpu.memory_space<vmem>>, %arg2: memref<1x32xf32, #tpu.memory_space<vmem>>, %arg3: memref<1xf32, #tpu.memory_space<smem>>, %arg4: memref<1x128xf32, #tpu.memory_space<vmem>>) attributes {dimension_semantics = [#tpu.dimension_semantics<parallel>], iteration_bounds = array<i64: 1>, scalar_prefetch = 0 : i64, scratch_operands = 0 : i64, tpu.core_type = #tpu.core_type<tc>, window_params = [{transform_indices = @transform_0, window_bounds = array<i64: 128, 32>}, {pipeline_mode = #tpu.pipeline_mode<synchronous>, transform_indices = @transform_1, window_bounds = array<i64: 1, 32>}, {transform_indices = @transform_2, window_bounds = array<i64: 1>}, {transform_indices = @transform_3, window_bounds = array<i64: 1, 128>}]} {
    %c0 = arith.constant 0 : index
    %c0_0 = arith.constant 0 : index
    %0 = vector.load %arg2[%c0, %c0_0] : memref<1x32xf32, #tpu.memory_space<vmem>>, vector<1x32xf32>
    %c0_1 = arith.constant 0 : index
    %c0_2 = arith.constant 0 : index
    %1 = vector.load %arg1[%c0_1, %c0_2] : memref<128x32xf32, #tpu.memory_space<vmem>>, vector<128x32xf32>
    %cst = arith.constant dense<0.000000e+00> : vector<1x128xf32>
    %2 = tpu.matmul %0, %1, %cst {dimension_numbers = #tpu.dot_dimension_numbers<[1], [1], [0], [0], [0, 0, 1, 0], [], []>} : vector<1x32xf32>, vector<128x32xf32>, vector<1x128xf32> -> vector<1x128xf32>
    %c0_3 = arith.constant 0 : index
    %3 = memref.load %arg3[%c0_3] : memref<1xf32, #tpu.memory_space<smem>>
    %4 = vector.broadcast %3 : f32 to vector<1x128xf32>
    %5 = arith.addf %2, %4 : vector<1x128xf32>
    %6 = arith.negf %5 : vector<1x128xf32>
    %7 = math.exp %6 : vector<1x128xf32>
    %cst_4 = arith.constant 1.000000e+00 : f32
    %8 = vector.broadcast %cst_4 : f32 to vector<1x128xf32>
    %9 = arith.addf %8, %7 : vector<1x128xf32>
    %10 = arith.divf %8, %9 : vector<1x128xf32>
    %c0_5 = arith.constant 0 : index
    %c0_6 = arith.constant 0 : index
    %11 = vector.load %arg4[%c0_5, %c0_6] : memref<1x128xf32, #tpu.memory_space<vmem>>, vector<1x128xf32>
    tpu.vector_store %arg4[%c0_5, %c0_6], %10 {strides = array<i32>} : memref<1x128xf32, #tpu.memory_space<vmem>>, vector<1x128xf32>,
    return
  }
  func.func @transform_0(%arg0: i32) -> (i32, i32) {
    %c0_i32 = arith.constant 0 : i32
    %c0_i32_0 = arith.constant 0 : i32
    return %arg0, %c0_i32 : i32, i32
  }
  func.func @transform_1(%arg0: i32) -> (i32, i32) {
    %c0_i32 = arith.constant 0 : i32
    %c0_i32_0 = arith.constant 0 : i32
    %c0_i32_1 = arith.constant 0 : i32
    return %c0_i32, %c0_i32_0 : i32, i32
  }
  func.func @transform_2(%arg0: i32) -> i32 {
    %c0_i32 = arith.constant 0 : i32
    %c0_i32_0 = arith.constant 0 : i32
    return %c0_i32 : i32
  }
  func.func @transform_3(%arg0: i32) -> (i32, i32) {
    %c0_i32 = arith.constant 0 : i32
    %c0_i32_0 = arith.constant 0 : i32
    return %c0_i32, %arg0 : i32, i32
  }
}

</mosaic_0001>

<bundles_post_ra>
// kernel: logistic_regression_forward.1
= control target key start
LH: loop header
LB: loop body
LE: loop exit
PB: predicated region body
PF: predicated region fallthrough
CT: control target
= control target key end

     0   :  { %vm34_vm0 = vcmask 261120   ;;  %s246_s0 = inlined_call_operand.vmem [shape: f32[128,32], index: 0, kind: input, shape index: {}]   ;;  %s247_s1 = inlined_call_operand.vmem [shape: f32[1,32], index: 1, kind: input, shape index: {}]   ;;  %s248_s2 = inlined_call_operand.<no memory space> [shape: f32[1], index: 2, kind: input, shape index: {}]   ;;  %s249_s3 = inlined_call_operand.vmem [shape: f32[1,128], index: 3, kind: output, shape index: {}]  }
   0x1   :  { %v31_v0 = vld [vmem:[%s246_s0 + $0x78] sm:$0xff]  ;;  %v30_v1 = vld [vmem:[%s246_s0 + $0x70] sm:$0xff]  ;;  %v29_v2 = vld [vmem:[%s246_s0 + $0x68] sm:$0xff]  ;;  %v33_v17 = vstv %s248_s2 }
   0x2   :  { %130 = vmatpush.xpose.msk.msra.mxu0 %vm34_vm0, %v31_v0  ;;  %v28_v3 = vld [vmem:[%s246_s0 + $0x60] sm:$0xff]  ;;  %v27_v4 = vld [vmem:[%s246_s0 + $0x58] sm:$0xff]  ;;  %v26_v5 = vld [vmem:[%s246_s0 + $0x50] sm:$0xff] }
   0x3   :  { %v25_v6 = vld [vmem:[%s246_s0 + $0x48] sm:$0xff]  ;;  %v24_v7 = vld [vmem:[%s246_s0 + $0x40] sm:$0xff]  ;;  %v23_v8 = vld [vmem:[%s246_s0 + $0x38] sm:$0xff] }
   0x4   :  { %v22_v9 = vld [vmem:[%s246_s0 + $0x30] sm:$0xff]  ;;  %v21_v10 = vld [vmem:[%s246_s0 + $0x28] sm:$0xff]  ;;  %v20_v11 = vld [vmem:[%s246_s0 + $0x20] sm:$0xff] }
   0x5   :  { %v19_v12 = vld [vmem:[%s246_s0 + $0x18] sm:$0xff]  ;;  %v18_v13 = vld [vmem:[%s246_s0 + $0x10] sm:$0xff]  ;;  %v17_v14 = vld [vmem:[%s246_s0 + $0x8] sm:$0xff] }
   0x6   :  { %131 = vmatpush.xpose.msk.msra.mxu0 %vm34_vm0, %v30_v1  ;;  %v16_v15 = vld [vmem:[%s246_s0] sm:$0xff] }
   0x7   :  { %v15_v16 = vld [vmem:[%s247_s1] sm:$0x1] }
   0xa   :  { %132 = vmatpush.xpose.msk.msra.mxu0 %vm34_vm0, %v29_v2 }
   0xe   :  { %133 = vmatpush.xpose.msk.msra.mxu0 %vm34_vm0, %v28_v3 }
  0x12   :  { %134 = vmatpush.xpose.msk.msra.mxu0 %vm34_vm0, %v27_v4 }
  0x16   :  { %135 = vmatpush.xpose.msk.msra.mxu0 %vm34_vm0, %v26_v5 }
  0x1a   :  { %136 = vmatpush.xpose.msk.msra.mxu0 %vm34_vm0, %v25_v6 }
  0x1e   :  { %137 = vmatpush.xpose.msk.msra.mxu0 %vm34_vm0, %v24_v7 }
  0x22   :  { %138 = vmatpush.xpose.msk.msra.mxu0 %vm34_vm0, %v23_v8 }
  0x26   :  { %139 = vmatpush.xpose.msk.msra.mxu0 %vm34_vm0, %v22_v9 }
  0x2a   :  { %140 = vmatpush.xpose.msk.msra.mxu0 %vm34_vm0, %v21_v10 }
  0x2e   :  { %141 = vmatpush.xpose.msk.msra.mxu0 %vm34_vm0, %v20_v11 }
  0x32   :  { %142 = vmatpush.xpose.msk.msra.mxu0 %vm34_vm0, %v19_v12 }
  0x36   :  { %143 = vmatpush.xpose.msk.msra.mxu0 %vm34_vm0, %v18_v13 }
  0x3a   :  { %144 = vmatpush.xpose.msk.msra.mxu0 %vm34_vm0, %v17_v14 }
  0x3e   :  { %145 = vmatpush.xpose.msk.msra.mxu0 %vm34_vm0, %v16_v15 }
  0x41   :  { %146 = vmatmul.msk.f32.vlgmr.msra.gmra.mxu0 %vm34_vm0, %v15_v16 }
  0xbe   :  { %v103_v18 = vpop.f32.mrf.mxu0 }
  0xbf   :  { %v104_v19 = vadd.f32 %v103_v18, %v33_v17 }
  0xc1   :  { %v147_v20 = vmul.f32 -1.442695, %v104_v19 }
  0xc3   :  { %148 = vpow2.f32 %v147_v20 }
  0xc9   :  { %v149_v21 = vpop.eup %148 }
  0xca   :  { %v109_v22 = vadd.f32 1.0, %v149_v21 }
  0xcc   :  { %150 = vrcp.f32 %v109_v22  ;;  %v121_v26 = vand.u32 2147483648, %v109_v22  ;;  %v119_v28 = vand.u32 2147483647, %v109_v22  ;;  %vm115_vm2 = vweird.f32 %v109_v22 }
  0xce   :  { %v122_v30 = vor.u32 1.1754944e-38, %v121_v26  ;;  %vm120_vm4 = vcmp.eq.f32.partialorder %v119_v28, 8.507059e+37 }
  0xd2   :  { %v151_v23 = vpop.eup %150 }
  0xd3   :  { %v111_v24 = vmul.f32 %v151_v23, %v109_v22  ;;  %vm116_vm1 = vweird.f32 %v151_v23 }
  0xd4   :  { %vm117_vm3 = vmor %vm115_vm2, %vm116_vm1 }
  0xd5   :  { %v112_v25 = vsub.f32 1.0, %v111_v24 }
  0xd7   :  { %v113_v27 = vmul.f32 %v151_v23, %v112_v25 }
  0xd9   :  { %v114_v29 = vadd.f32 %v151_v23, %v113_v27 }
  0xdb   :  { %v118_v31 = vsel %vm117_vm3, %v151_v23, %v114_v29 }
  0xdc   :  { %v123_v32 = vsel %vm120_vm4, %v122_v30, %v118_v31 }
  0xdd   :  { %125 = vst [vmem:[%s249_s3] sm:$0x1] %v123_v32 }

</bundles_post_ra>
